<compile_context>
chip_gen: v7x
topology: tpu7x:2x2x1
jax: 0.10.0
libtpu: 0.0.40
codegen_flags: <defaults>
</compile_context>

<pallas_src>
import functools

import jax
import jax.numpy as jnp
from jax import lax
from jax.experimental import pallas as pl
from jax.experimental.pallas import tpu as pltpu


def gcn_kernel(a_ik_ref, a_ki_ref, xk_ref, xi_ref, wcat_ref, b_ref,
               o_ref, feat_acc):
    k = pl.program_id(1)
    nk = pl.num_programs(1)
    D = xk_ref.shape[1]  # padded feature width (din_p)

    @pl.when(k == 0)
    def _init():
        feat_acc[...] = jnp.zeros_like(feat_acc)

    # A tiles are stored bf16 (exact 0/1) to halve HBM traffic; upcast to f32
    # so all arithmetic matches the f32 reference exactly.
    a_ik = a_ik_ref[...].astype(jnp.float32)   # A[i_blk, k_blk]   (TM, TK)
    a_ki = a_ki_ref[...].astype(jnp.float32)   # A[k_blk, i_blk]   (TK, TM)
    xk = xk_ref[...]                           # X[k_blk]          (TK, D)

    # Incoming neighbors:  (A^T X)[i_blk] += A[k_blk, i_blk]^T-contracted X[k_blk].
    # Expressed as a dot_general contraction over axis 0 -> no transposed copy.
    feat_acc[:, D:2 * D] += lax.dot_general(
        a_ki, xk,
        dimension_numbers=(((0,), (0,)), ((), ())),
        preferred_element_type=jnp.float32)

    # Outgoing neighbors:  (A X)[i_blk] += A[i_blk, k_blk] @ X[k_blk].
    feat_acc[:, 2 * D:3 * D] += jnp.dot(
        a_ik, xk, preferred_element_type=jnp.float32)

    @pl.when(k == nk - 1)
    def _finalize():
        # Fused projection: [X | A^T X | A X] @ [W^T; U^T; V^T]  (one MXU pass
        # with K = 3*D) plus the pre-summed bias, written lane-dense.
        feat_acc[:, 0:D] = xi_ref[...]
        o_ref[...] = (
            jnp.dot(feat_acc[...], wcat_ref[...],
                    preferred_element_type=jnp.float32)
            + b_ref[...]
        ).astype(o_ref.dtype)


def _round_up(x, m):
    return ((x + m - 1) // m) * m


@functools.partial(jax.jit, static_argnames=("tile",))
def gcn_forward(X, A, W, U, V, bW, bU, bV, *, tile=512):
    """GCN forward:  W x + U * sum(incoming) + V * sum(outgoing) + b.

    X: (N, din) f32, A: (N, N), W/U/V: (dout, din) torch-Linear layout,
    bW/bU/bV: (dout,).  Returns (N, dout) f32.
    """
    N, din = X.shape
    dout = W.shape[0]

    LANE = 128
    din_p = _round_up(din, LANE)
    dout_p = _round_up(dout, LANE)
    n128 = _round_up(N, LANE)
    tile = min(tile, n128)
    n_p = _round_up(n128, tile)

    # Zero padding preserves the math (padded A rows/cols and X cols are zero).
    Xp = jnp.zeros((n_p, din_p), jnp.float32).at[:N, :din].set(
        X.astype(jnp.float32))
    Ap = jnp.zeros((n_p, n_p), jnp.bfloat16).at[:N, :N].set(
        A.astype(jnp.bfloat16))

    # Stack the three (pre-transposed) weights into one (3*din_p, dout_p)
    # operand so the output projection is a single MXU matmul.
    Wcat = jnp.zeros((3 * din_p, dout_p), jnp.float32)
    Wcat = Wcat.at[0:din, :dout].set(W.T.astype(jnp.float32))
    Wcat = Wcat.at[din_p:din_p + din, :dout].set(U.T.astype(jnp.float32))
    Wcat = Wcat.at[2 * din_p:2 * din_p + din, :dout].set(V.T.astype(jnp.float32))
    b_sum = jnp.zeros((1, dout_p), jnp.float32).at[0, :dout].set(
        (bW + bU + bV).astype(jnp.float32))

    grid = (n_p // tile, n_p // tile)

    flops = 2 * 2 * n_p * n_p * din_p + 2 * n_p * (3 * din_p) * dout_p
    bytes_accessed = (2 * Ap.size * 2      # A streamed via two BlockSpecs, bf16
                      + 2 * Xp.size * 4    # X[k] and X[i] streams
                      + Wcat.size * 4 + b_sum.size * 4
                      + n_p * dout_p * 4)  # output

    out_p = pl.pallas_call(
        gcn_kernel,
        out_shape=jax.ShapeDtypeStruct((n_p, dout_p), jnp.float32),
        grid_spec=pltpu.PrefetchScalarGridSpec(
            num_scalar_prefetch=0,
            grid=grid,
            in_specs=[
                pl.BlockSpec((tile, tile), lambda i, k: (i, k)),       # A[i,k]
                pl.BlockSpec((tile, tile), lambda i, k: (k, i)),       # A[k,i]
                pl.BlockSpec((tile, din_p), lambda i, k: (k, 0)),      # X[k]
                pl.BlockSpec((tile, din_p), lambda i, k: (i, 0)),      # X[i]
                pl.BlockSpec((3 * din_p, dout_p), lambda i, k: (0, 0)),  # Wcat
                pl.BlockSpec((1, dout_p), lambda i, k: (0, 0)),        # bias
            ],
            out_specs=pl.BlockSpec((tile, dout_p), lambda i, k: (i, 0)),
            scratch_shapes=[pltpu.VMEM((tile, 3 * din_p), jnp.float32)],
        ),
        compiler_params=pltpu.CompilerParams(
            dimension_semantics=("parallel", "arbitrary"),
            vmem_limit_bytes=32 * 1024 * 1024,
        ),
        cost_estimate=pl.CostEstimate(
            flops=flops, transcendentals=0, bytes_accessed=bytes_accessed),
    )(Ap, Ap, Xp, Xp, Wcat, b_sum)

    return out_p[:N, :dout]


def init_linear_params(key, dim_in, dim_out):
    """torch.nn.Linear-style init: weight (dout, din), bias (dout,)."""
    kw, kb = jax.random.split(key)
    bound = 1.0 / jnp.sqrt(jnp.float32(dim_in))
    Wgt = jax.random.uniform(kw, (dim_out, dim_in), jnp.float32, -bound, bound)
    b = jax.random.uniform(kb, (dim_out,), jnp.float32, -bound, bound)
    return Wgt, b


def gcn_reference(X, A, W, U, V, bW, bU, bV):
    """Pure-JAX reference identical to the PyTorch module."""
    return (X @ W.T + bW) + (A.T @ X) @ U.T + bU + (A @ X) @ V.T + bV


def _make_inputs(key, N, dim_in, dim_out):
    kx, ka, ku, kv, kw = jax.random.split(key, 5)
    X = jax.random.normal(kx, (N, dim_in), jnp.float32)
    A = (jax.random.uniform(ka, (N, N)) > 0.5).astype(jnp.float32)
    A = A * (1.0 - jnp.eye(N, dtype=jnp.float32))      # no self-loops
    U, bU = init_linear_params(ku, dim_in, dim_out)
    V, bV = init_linear_params(kv, dim_in, dim_out)
    W, bW = init_linear_params(kw, dim_in, dim_out)
    return X, A, W, U, V, bW, bU, bV


if __name__ == "__main__":
    dim_in, dim_out = 16, 32
    key = jax.random.PRNGKey(0)
    k_small, k_big = jax.random.split(key)

    # 1) Small shape matching the module's toy usage (single-tile grid).
    X, A, W, U, V, bW, bU, bV = _make_inputs(k_small, 8, dim_in, dim_out)
    out = jax.block_until_ready(gcn_forward(X, A, W, U, V, bW, bU, bV))
    ref = gcn_reference(X, A, W, U, V, bW, bU, bV)
    assert out.shape == (8, dim_out)
    assert jnp.allclose(out, ref, atol=1e-4, rtol=1e-4)

    # 2) Larger graph with a small tile to exercise the multi-tile grid,
    #    the "arbitrary" reduction axis, and the accumulator init/finalize.
    Xb, Ab, Wb, Ub, Vb, bWb, bUb, bVb = _make_inputs(k_big, 300, dim_in, dim_out)
    out_b = jax.block_until_ready(
        gcn_forward(Xb, Ab, Wb, Ub, Vb, bWb, bUb, bVb, tile=128))
    ref_b = gcn_reference(Xb, Ab, Wb, Ub, Vb, bWb, bUb, bVb)
    assert out_b.shape == (300, dim_out)
    assert jnp.allclose(out_b, ref_b, atol=1e-3, rtol=1e-3)

    print("KERNEL_OK")
</pallas_src>

<mosaic_0001>
module attributes {stable_mosaic.version = 11 : i64} {
  func.func @gcn_kernel(%arg0: i32, %arg1: i32, %arg2: memref<128x128xbf16, #tpu.memory_space<vmem>>, %arg3: memref<128x128xbf16, #tpu.memory_space<vmem>>, %arg4: memref<128x128xf32, #tpu.memory_space<vmem>>, %arg5: memref<128x128xf32, #tpu.memory_space<vmem>>, %arg6: memref<384x128xf32, #tpu.memory_space<vmem>>, %arg7: memref<1x128xf32, #tpu.memory_space<vmem>>, %arg8: memref<128x128xf32, #tpu.memory_space<vmem>>, %arg9: memref<128x384xf32, #tpu.memory_space<vmem>>) attributes {dimension_semantics = [#tpu.dimension_semantics<parallel>, #tpu.dimension_semantics<arbitrary>], iteration_bounds = array<i64: 1, 1>, scalar_prefetch = 0 : i64, scratch_operands = 1 : i64, tpu.core_type = #tpu.core_type<tc>, window_params = [{transform_indices = @transform_0, window_bounds = array<i64: 128, 128>}, {transform_indices = @transform_1, window_bounds = array<i64: 128, 128>}, {transform_indices = @transform_2, window_bounds = array<i64: 128, 128>}, {transform_indices = @transform_3, window_bounds = array<i64: 128, 128>}, {pipeline_mode = #tpu.pipeline_mode<synchronous>, transform_indices = @transform_4, window_bounds = array<i64: 384, 128>}, {pipeline_mode = #tpu.pipeline_mode<synchronous>, transform_indices = @transform_5, window_bounds = array<i64: 1, 128>}, {transform_indices = @transform_6, window_bounds = array<i64: 128, 128>}]} {
    %c0_i32 = arith.constant 0 : i32
    %0 = arith.cmpi eq, %arg1, %c0_i32 : i32
    %1 = arith.extui %0 : i1 to i32
    %c0_i32_0 = arith.constant 0 : i32
    %2 = arith.cmpi ne, %1, %c0_i32_0 : i32
    scf.if %2 {
      %cst_15 = arith.constant 0.000000e+00 : f32
      %19 = vector.broadcast %cst_15 : f32 to vector<128x384xf32>
      %c0_16 = arith.constant 0 : index
      %c0_17 = arith.constant 0 : index
      %20 = vector.load %arg9[%c0_16, %c0_17] : memref<128x384xf32, #tpu.memory_space<vmem>>, vector<128x384xf32>
      tpu.vector_store %arg9[%c0_16, %c0_17], %19 {strides = array<i32>} : memref<128x384xf32, #tpu.memory_space<vmem>>, vector<128x384xf32>,
    } else {
    }
    %c0 = arith.constant 0 : index
    %c0_1 = arith.constant 0 : index
    %3 = vector.load %arg2[%c0, %c0_1] : memref<128x128xbf16, #tpu.memory_space<vmem>>, vector<128x128xbf16>
    %4 = arith.extf %3 : vector<128x128xbf16> to vector<128x128xf32>
    %c0_2 = arith.constant 0 : index
    %c0_3 = arith.constant 0 : index
    %5 = vector.load %arg3[%c0_2, %c0_3] : memref<128x128xbf16, #tpu.memory_space<vmem>>, vector<128x128xbf16>
    %6 = arith.extf %5 : vector<128x128xbf16> to vector<128x128xf32>
    %c0_4 = arith.constant 0 : index
    %c0_5 = arith.constant 0 : index
    %7 = vector.load %arg4[%c0_4, %c0_5] : memref<128x128xf32, #tpu.memory_space<vmem>>, vector<128x128xf32>
    %c0_6 = arith.constant 0 : index
    %c128 = arith.constant 128 : index
    %8 = vector.load %arg9[%c0_6, %c128] : memref<128x384xf32, #tpu.memory_space<vmem>>, vector<128x128xf32>
    %cst = arith.constant dense<0.000000e+00> : vector<128x128xf32>
    %9 = tpu.matmul %6, %7, %cst {dimension_numbers = #tpu.dot_dimension_numbers<[0], [0], [1], [1], [0, 1, 1, 1], [], []>} : vector<128x128xf32>, vector<128x128xf32>, vector<128x128xf32> -> vector<128x128xf32>
    %10 = arith.addf %8, %9 : vector<128x128xf32>
    %c0_7 = arith.constant 0 : index
    %c128_8 = arith.constant 128 : index
    %11 = vector.load %arg9[%c0_7, %c128_8] : memref<128x384xf32, #tpu.memory_space<vmem>>, vector<128x128xf32>
    tpu.vector_store %arg9[%c0_7, %c128_8], %10 {strides = array<i32>} : memref<128x384xf32, #tpu.memory_space<vmem>>, vector<128x128xf32>,
    %c0_9 = arith.constant 0 : index
    %c256 = arith.constant 256 : index
    %12 = vector.load %arg9[%c0_9, %c256] : memref<128x384xf32, #tpu.memory_space<vmem>>, vector<128x128xf32>
    %cst_10 = arith.constant dense<0.000000e+00> : vector<128x128xf32>
    %13 = tpu.matmul %4, %7, %cst_10 {dimension_numbers = #tpu.dot_dimension_numbers<[1], [0], [0], [1], [0, 0, 1, 1], [], []>} : vector<128x128xf32>, vector<128x128xf32>, vector<128x128xf32> -> vector<128x128xf32>
    %14 = arith.addf %12, %13 : vector<128x128xf32>
    %c0_11 = arith.constant 0 : index
    %c256_12 = arith.constant 256 : index
    %15 = vector.load %arg9[%c0_11, %c256_12] : memref<128x384xf32, #tpu.memory_space<vmem>>, vector<128x128xf32>
    tpu.vector_store %arg9[%c0_11, %c256_12], %14 {strides = array<i32>} : memref<128x384xf32, #tpu.memory_space<vmem>>, vector<128x128xf32>,
    %c0_i32_13 = arith.constant 0 : i32
    %16 = arith.cmpi eq, %arg1, %c0_i32_13 : i32
    %17 = arith.extui %16 : i1 to i32
    %c0_i32_14 = arith.constant 0 : i32
    %18 = arith.cmpi ne, %17, %c0_i32_14 : i32
    scf.if %18 {
      %c0_15 = arith.constant 0 : index
      %c0_16 = arith.constant 0 : index
      %19 = vector.load %arg5[%c0_15, %c0_16] : memref<128x128xf32, #tpu.memory_space<vmem>>, vector<128x128xf32>
      %c0_17 = arith.constant 0 : index
      %c0_18 = arith.constant 0 : index
      %20 = vector.load %arg9[%c0_17, %c0_18] : memref<128x384xf32, #tpu.memory_space<vmem>>, vector<128x128xf32>
      tpu.vector_store %arg9[%c0_17, %c0_18], %19 {strides = array<i32>} : memref<128x384xf32, #tpu.memory_space<vmem>>, vector<128x128xf32>,
      %c0_19 = arith.constant 0 : index
      %c0_20 = arith.constant 0 : index
      %21 = vector.load %arg9[%c0_19, %c0_20] : memref<128x384xf32, #tpu.memory_space<vmem>>, vector<128x384xf32>
      %c0_21 = arith.constant 0 : index
      %c0_22 = arith.constant 0 : index
      %22 = vector.load %arg6[%c0_21, %c0_22] : memref<384x128xf32, #tpu.memory_space<vmem>>, vector<384x128xf32>
      %cst_23 = arith.constant dense<0.000000e+00> : vector<128x128xf32>
      %23 = tpu.matmul %21, %22, %cst_23 {dimension_numbers = #tpu.dot_dimension_numbers<[1], [0], [0], [1], [0, 0, 1, 1], [], []>} : vector<128x384xf32>, vector<384x128xf32>, vector<128x128xf32> -> vector<128x128xf32>
      %c0_24 = arith.constant 0 : index
      %c0_25 = arith.constant 0 : index
      %24 = vector.load %arg7[%c0_24, %c0_25] : memref<1x128xf32, #tpu.memory_space<vmem>>, vector<1x128xf32>
      %25 = vector.broadcast %24 : vector<1x128xf32> to vector<128x128xf32>
      %26 = arith.addf %23, %25 : vector<128x128xf32>
      %c0_26 = arith.constant 0 : index
      %c0_27 = arith.constant 0 : index
      %27 = vector.load %arg8[%c0_26, %c0_27] : memref<128x128xf32, #tpu.memory_space<vmem>>, vector<128x128xf32>
      tpu.vector_store %arg8[%c0_26, %c0_27], %26 {strides = array<i32>} : memref<128x128xf32, #tpu.memory_space<vmem>>, vector<128x128xf32>,
    } else {
    }
    return
  }
  func.func @transform_0(%arg0: i32, %arg1: i32) -> (i32, i32) {
    %c0_i32 = arith.constant 0 : i32
    return %arg0, %arg1 : i32, i32
  }
  func.func @transform_1(%arg0: i32, %arg1: i32) -> (i32, i32) {
    %c0_i32 = arith.constant 0 : i32
    return %arg1, %arg0 : i32, i32
  }
  func.func @transform_2(%arg0: i32, %arg1: i32) -> (i32, i32) {
    %c0_i32 = arith.constant 0 : i32
    %c0_i32_0 = arith.constant 0 : i32
    return %arg1, %c0_i32 : i32, i32
  }
  func.func @transform_3(%arg0: i32, %arg1: i32) -> (i32, i32) {
    %c0_i32 = arith.constant 0 : i32
    %c0_i32_0 = arith.constant 0 : i32
    return %arg0, %c0_i32 : i32, i32
  }
  func.func @transform_4(%arg0: i32, %arg1: i32) -> (i32, i32) {
    %c0_i32 = arith.constant 0 : i32
    %c0_i32_0 = arith.constant 0 : i32
    %c0_i32_1 = arith.constant 0 : i32
    return %c0_i32, %c0_i32_0 : i32, i32
  }
  func.func @transform_5(%arg0: i32, %arg1: i32) -> (i32, i32) {
    %c0_i32 = arith.constant 0 : i32
    %c0_i32_0 = arith.constant 0 : i32
    %c0_i32_1 = arith.constant 0 : i32
    return %c0_i32, %c0_i32_0 : i32, i32
  }
  func.func @transform_6(%arg0: i32, %arg1: i32) -> (i32, i32) {
    %c0_i32 = arith.constant 0 : i32
    %c0_i32_0 = arith.constant 0 : i32
    return %arg0, %c0_i32 : i32, i32
  }
}

</mosaic_0001>

<bundles_post_ra>
// kernel: gcn_forward.1
= control target key start
LH: loop header
LB: loop body
LE: loop exit
PB: predicated region body
PF: predicated region fallthrough
CT: control target
= control target key end

     0   :  { %s1992_s1 = inlined_call_operand.vmem [shape: bf16[128,128], index: 1, kind: input, shape index: {}, may-alias: {0,1}]   ;;  %s1993_s2 = inlined_call_operand.vmem [shape: f32[128,128], index: 2, kind: input, shape index: {}, may-alias: {2,3}]   ;;  %s1994_s0 = inlined_call_operand.vmem [shape: bf16[128,128], index: 0, kind: input, shape index: {}, may-alias: {0,1}]   ;;  %s1995_s4 = inlined_call_operand.vmem [shape: f32[384,128], index: 4, kind: input, shape index: {}]   ;;  %s1996_s3 = inlined_call_operand.vmem [shape: f32[128,128], index: 3, kind: input, shape index: {}, may-alias: {2,3}]   ;;  %s1997_s5 = inlined_call_operand.vmem [shape: f32[1,128], index: 5, kind: input, shape index: {}]   ;;  %s1998_s6 = inlined_call_operand.vmem [shape: f32[128,128], index: 6, kind: output, shape index: {}]  }
   0x1   :  { %v1055_v0 = vld [vmem:[%s1992_s1] sm:$0xff]   ;;  %v140_v4 = vld [vmem:[%s1993_s2 + $0x8] sm:$0xff]  ;;  %v141_v5 = vld [vmem:[%s1993_s2 + $0x10] sm:$0xff] }
   0x2   :  { %v1056_v1 = vunpack.c.l.bf16 %v1055_v0  ;;  %v139_v2 = vld [vmem:[%s1993_s2] sm:$0xff]  ;;  %v1057_v3 = vunpack.c.h.bf16 %v1055_v0  ;;  %v142_v6 = vld [vmem:[%s1993_s2 + $0x18] sm:$0xff]  ;;  %v1093_v7 = vld [vmem:[%s1992_s1 + $0x8] sm:$0xff]  }
   0x3   :  { %v1444_v8 = vpack.c.bf16 %v140_v4, %v139_v2  ;;  %v1448_v9 = vpack.c.bf16 %v142_v6, %v141_v5  ;;  %v143_v10 = vld [vmem:[%s1993_s2 + $0x20] sm:$0xff]  ;;  %v144_v11 = vld [vmem:[%s1993_s2 + $0x28] sm:$0xff]  ;;  %v1060_v12 = vunpack.c.l.bf16 %v1093_v7  ;;  %v145_v16 = vld [vmem:[%s1993_s2 + $0x30] sm:$0xff]  ;;  %v1061_v18 = vunpack.c.h.bf16 %v1093_v7 }
   0x4   :  { %171 = vxpose.xlu0.b32.start [1/16] %v1056_v1, 128  ;;  %v1634_v13 = vld [vmem:[%s1994_s0] sm:$0xff]   ;;  %v1452_v14 = vpack.c.bf16 %v144_v11, %v143_v10  ;;  %v146_v17 = vld [vmem:[%s1993_s2 + $0x38] sm:$0xff]  ;;  %v1094_v19 = vld [vmem:[%s1992_s1 + $0x10] sm:$0xff]  }
   0x5   :  { %1445 = vmatprep.subr.bf16.mxu0 %v1444_v8  ;;  %1477 = vmatprep.subr.bf16.mxu1 %v1444_v8  ;;  %v1024_v15 = vunpack.c.l.bf16 %v1634_v13  ;;  %v1456_v20 = vpack.c.bf16 %v146_v17, %v145_v16  ;;  %v147_v21 = vld [vmem:[%s1993_s2 + $0x40] sm:$0xff]  ;;  %v148_v22 = vld [vmem:[%s1993_s2 + $0x48] sm:$0xff]  ;;  %v1064_v23 = vunpack.c.l.bf16 %v1094_v19  ;;  %v149_v25 = vld [vmem:[%s1993_s2 + $0x50] sm:$0xff]  ;;  %v1065_v27 = vunpack.c.h.bf16 %v1094_v19 }
   0x6   :  { %1447 = vmatpush3.bf16.msra.mxu0 %v1444_v8  ;;  %1479 = vmatpush3.bf16.msra.mxu1 %v1444_v8  ;;  %v1460_v24 = vpack.c.bf16 %v148_v22, %v147_v21  ;;  %v150_v26 = vld [vmem:[%s1993_s2 + $0x58] sm:$0xff]  ;;  %v151_v30 = vld [vmem:[%s1993_s2 + $0x60] sm:$0xff]  ;;  %v152_v31 = vld [vmem:[%s1993_s2 + $0x68] sm:$0xff]  ;;  %v1025_v43 = vunpack.c.h.bf16 %v1634_v13 }
   0x7   :  { %1449 = vmatprep.subr.bf16.mxu0 %v1448_v9  ;;  %1481 = vmatprep.subr.bf16.mxu1 %v1448_v9  ;;  %v1095_v28 = vld [vmem:[%s1992_s1 + $0x18] sm:$0xff]   ;;  %v1464_v29 = vpack.c.bf16 %v150_v26, %v149_v25  ;;  %v1468_v33 = vpack.c.bf16 %v152_v31, %v151_v30  ;;  %v153_v34 = vld [vmem:[%s1993_s2 + $0x70] sm:$0xff]  ;;  %v1096_v37 = vld [vmem:[%s1992_s1 + $0x20] sm:$0xff]  }
   0x8   :  { %172 = vxpose.xlu0.b32.cont [2/16] %v1057_v3, 128  ;;  %1364 = vmatprep.mubr.f32.mxu1 %v1024_v15  ;;  %v1068_v32 = vunpack.c.l.bf16 %v1095_v28  ;;  %v154_v35 = vld [vmem:[%s1993_s2 + $0x78] sm:$0xff]  ;;  %v1069_v36 = vunpack.c.h.bf16 %v1095_v28  ;;  %v1072_v39 = vunpack.c.l.bf16 %v1096_v37  ;;  %v1086_v40 = vld [vmem:[%s1994_s0 + $0x8] sm:$0xff]   ;;  %v1073_v41 = vunpack.c.h.bf16 %v1096_v37  ;;  %v1087_v45 = vld [vmem:[%s1994_s0 + $0x10] sm:$0xff]  }
   0x9   :  { %v1472_v38 = vpack.c.bf16 %v154_v35, %v153_v34  ;;  %v1097_v42 = vld [vmem:[%s1992_s1 + $0x28] sm:$0xff]   ;;  %v1028_v44 = vunpack.c.l.bf16 %v1086_v40  ;;  %v1029_v47 = vunpack.c.h.bf16 %v1086_v40  ;;  %v1032_v48 = vunpack.c.l.bf16 %v1087_v45  ;;  %v1088_v49 = vld [vmem:[%s1994_s0 + $0x18] sm:$0xff]   ;;  %v1098_v51 = vld [vmem:[%s1992_s1 + $0x30] sm:$0xff]  }
   0xa   :  { %1451 = vmatpush3.bf16.msra.mxu0 %v1448_v9  ;;  %1483 = vmatpush3.bf16.msra.mxu1 %v1448_v9  ;;  %v1076_v46 = vunpack.c.l.bf16 %v1097_v42  ;;  %v1077_v50 = vunpack.c.h.bf16 %v1097_v42  ;;  %v1033_v52 = vunpack.c.h.bf16 %v1087_v45  ;;  %v1036_v53 = vunpack.c.l.bf16 %v1088_v49  ;;  %v1089_v54 = vld [vmem:[%s1994_s0 + $0x20] sm:$0xff]   ;;  %v1090_v58 = vld [vmem:[%s1994_s0 + $0x28] sm:$0xff]   ;;  %v1099_v60 = vld [vmem:[%s1992_s1 + $0x38] sm:$0xff]  }
   0xb   :  { %1453 = vmatprep.subr.bf16.mxu0 %v1452_v14  ;;  %1485 = vmatprep.subr.bf16.mxu1 %v1452_v14  ;;  %v1080_v55 = vunpack.c.l.bf16 %v1098_v51  ;;  %v1037_v56 = vunpack.c.h.bf16 %v1088_v49  ;;  %v1040_v57 = vunpack.c.l.bf16 %v1089_v54  ;;  %v1081_v59 = vunpack.c.h.bf16 %v1098_v51  ;;  %v1091_v1 = vld [vmem:[%s1994_s0 + $0x30] sm:$0xff]   ;;  %v1092_v5 = vld [vmem:[%s1994_s0 + $0x38] sm:$0xff]   ;;  %v672_v8 = vld [vmem:[%s1995_s4 + $0x80] sm:$0xff] }
   0xc   :  { %173 = vxpose.xlu0.b32.cont [3/16] %v1060_v12, 128  ;;  %v1041_v61 = vunpack.c.h.bf16 %v1089_v54  ;;  %v1044_v62 = vunpack.c.l.bf16 %v1090_v58  ;;  %v1084_v63 = vunpack.c.l.bf16 %v1099_v60  ;;  %v1045_v0 = vunpack.c.h.bf16 %v1090_v58  ;;  %v673_v9 = vld [vmem:[%s1995_s4 + $0x88] sm:$0xff]  ;;  %v688_v11 = vld [vmem:[%s1995_s4 + $0x100] sm:$0xff]  ;;  %v691_v15 = vld [vmem:[%s1995_s4 + $0x118] sm:$0xff] }
   0xd   :  { %v1048_v2 = vunpack.c.l.bf16 %v1091_v1  ;;  %v1085_v3 = vunpack.c.h.bf16 %v1099_v60  ;;  %v1049_v4 = vunpack.c.h.bf16 %v1091_v1  ;;  %v1052_v6 = vunpack.c.l.bf16 %v1092_v5  ;;  %v689_v12 = vld [vmem:[%s1995_s4 + $0x108] sm:$0xff]  ;;  %v692_v17 = vld [vmem:[%s1995_s4 + $0x120] sm:$0xff]  ;;  %v695_v21 = vld [vmem:[%s1995_s4 + $0x138] sm:$0xff] }
   0xe   :  { %1455 = vmatpush3.bf16.msra.mxu0 %v1452_v14  ;;  %1487 = vmatpush3.bf16.msra.mxu1 %v1452_v14  ;;  %v1053_v7 = vunpack.c.h.bf16 %v1092_v5  ;;  %v1508_v10 = vpack.c.bf16 %v673_v9, %v672_v8  ;;  %v1540_v13 = vpack.c.bf16 %v689_v12, %v688_v11  ;;  %v690_v14 = vld [vmem:[%s1995_s4 + $0x110] sm:$0xff]  ;;  %v701_v30 = vld [vmem:[%s1995_s4 + $0x168] sm:$0xff]  ;;  %v659_v40 = vld [vmem:[%s1995_s4 + $0x18] sm:$0xff] }
   0xf   :  { %1457 = vmatprep.subr.bf16.mxu0 %v1456_v20  ;;  %1489 = vmatprep.subr.bf16.mxu1 %v1456_v20  ;;  %v1544_v16 = vpack.c.bf16 %v691_v15, %v690_v14  ;;  %v698_v26 = vld [vmem:[%s1995_s4 + $0x150] sm:$0xff]  ;;  %v676_v42 = vld [vmem:[%s1995_s4 + $0xa0] sm:$0xff]  ;;  %v663_v54 = vld [vmem:[%s1995_s4 + $0x38] sm:$0xff] }
  0x10   :  { %174 = vxpose.xlu0.b32.cont [4/16] %v1061_v18, 128  ;;  %v693_v18 = vld [vmem:[%s1995_s4 + $0x128] sm:$0xff]  ;;  %v674_v35 = vld [vmem:[%s1995_s4 + $0x90] sm:$0xff]  ;;  %v664_v60 = vld [vmem:[%s1995_s4 + $0x40] sm:$0xff] }
  0x11   :  { %v1548_v19 = vpack.c.bf16 %v693_v18, %v692_v17  ;;  %v678_v49 = vld [vmem:[%s1995_s4 + $0xb0] sm:$0xff]  ;;  %v669_v11 = vld [vmem:[%s1995_s4 + $0x68] sm:$0xff]  ;;  %v687_v14 = vld [vmem:[%s1995_s4 + $0xf8] sm:$0xff] }
  0x12   :  { %1459 = vmatpush3.bf16.msra.mxu0 %v1456_v20  ;;  %1491 = vmatpush3.bf16.msra.mxu1 %v1456_v20  ;;  %v694_v20 = vld [vmem:[%s1995_s4 + $0x130] sm:$0xff]  ;;  %v671_v18 = vld [vmem:[%s1995_s4 + $0x78] sm:$0xff] }
  0x13   :  { %1461 = vmatprep.subr.bf16.mxu0 %v1460_v24  ;;  %1493 = vmatprep.subr.bf16.mxu1 %v1460_v24  ;;  %v1552_v22 = vpack.c.bf16 %v695_v21, %v694_v20  ;;  %v670_v17 = vld [vmem:[%s1995_s4 + $0x70] sm:$0xff] }
  0x14   :  { %175 = vxpose.xlu0.b32.cont [5/16] %v1064_v23, 128  ;;  %v696_v23 = vld [vmem:[%s1995_s4 + $0x140] sm:$0xff]  ;;  %v1538_v20 = vpack.c.bf16 %v671_v18, %v670_v17 }
  0x16   :  { %1463 = vmatpush3.bf16.msra.mxu0 %v1460_v24  ;;  %1495 = vmatpush3.bf16.msra.mxu1 %v1460_v24  ;;  %v697_v24 = vld [vmem:[%s1995_s4 + $0x148] sm:$0xff] }
  0x17   :  { %1465 = vmatprep.subr.bf16.mxu0 %v1464_v29  ;;  %1497 = vmatprep.subr.bf16.mxu1 %v1464_v29  ;;  %v1556_v25 = vpack.c.bf16 %v697_v24, %v696_v23 }
  0x18   :  { %176 = vxpose.xlu0.b32.cont [6/16] %v1065_v27, 128  ;;  %v699_v27 = vld [vmem:[%s1995_s4 + $0x158] sm:$0xff] }
  0x19   :  { %v1560_v28 = vpack.c.bf16 %v699_v27, %v698_v26 }
  0x1a   :  { %1467 = vmatpush3.bf16.msra.mxu0 %v1464_v29  ;;  %1499 = vmatpush3.bf16.msra.mxu1 %v1464_v29  ;;  %v700_v29 = vld [vmem:[%s1995_s4 + $0x160] sm:$0xff] }
  0x1b   :  { %1469 = vmatprep.subr.bf16.mxu0 %v1468_v33  ;;  %1501 = vmatprep.subr.bf16.mxu1 %v1468_v33  ;;  %v1564_v31 = vpack.c.bf16 %v701_v30, %v700_v29  ;;  %v702_v29 = vld [vmem:[%s1995_s4 + $0x170] sm:$0xff]  ;;  %v703_v30 = vld [vmem:[%s1995_s4 + $0x178] sm:$0xff] }
  0x1c   :  { %177 = vxpose.xlu0.b32.cont [7/16] %v1068_v32, 128  ;;  %v656_v32 = vld [vmem:[%s1995_s4] sm:$0xff] }
  0x1e   :  { %1471 = vmatpush3.bf16.msra.mxu0 %v1468_v33  ;;  %1503 = vmatpush3.bf16.msra.mxu1 %v1468_v33  ;;  %v657_v33 = vld [vmem:[%s1995_s4 + $0x8] sm:$0xff] }
  0x1f   :  { %1473 = vmatprep.subr.bf16.mxu0 %v1472_v38  ;;  %1505 = vmatprep.subr.bf16.mxu1 %v1472_v38  ;;  %v1510_v37 = vpack.c.bf16 %v657_v33, %v656_v32 }
  0x20   :  { %178 = vxpose.xlu0.b32.cont [8/16] %v1069_v36, 128  ;;  %v675_v36 = vld [vmem:[%s1995_s4 + $0x98] sm:$0xff] }
  0x22   :  { %1475 = vmatpush3.bf16.msra.mxu0 %v1472_v38  ;;  %1507 = vmatpush3.bf16.msra.mxu1 %v1472_v38  ;;  %v1512_v38 = vpack.c.bf16 %v675_v36, %v674_v35 }
  0x23   :  { %1509 = vmatprep.subr.bf16.mxu0 %v1508_v10  ;;  %1541 = vmatprep.subr.bf16.mxu1 %v1540_v13  ;;  %v668_v10 = vld [vmem:[%s1995_s4 + $0x60] sm:$0xff] }
  0x24   :  { %179 = vxpose.xlu0.b32.cont [9/16] %v1072_v39, 128  ;;  %v658_v39 = vld [vmem:[%s1995_s4 + $0x10] sm:$0xff]  ;;  %v1534_v15 = vpack.c.bf16 %v669_v11, %v668_v10  ;;  %v589_v11 = vld [vmem:[%s1996_s3 + $0x68] sm:$0xff] }
  0x25   :  { %1365 = vmatmul.mubr.f32.vlgmr.msra.gmra.mrb[0].mxu1 %v1025_v43  ;;  %v677_v43 = vld [vmem:[%s1995_s4 + $0xa8] sm:$0xff] }
  0x26   :  { %1367 = vmatprep.mubr.f32.mxu1 %v1028_v44  ;;  %1543 = vmatpush3.bf16.msra.mxu1 %v1540_v13  ;;  %v1514_v44 = vpack.c.bf16 %v659_v40, %v658_v39  ;;  %v1516_v45 = vpack.c.bf16 %v677_v43, %v676_v42  ;;  %v686_v13 = vld [vmem:[%s1995_s4 + $0xf0] sm:$0xff] }
  0x27   :  { %1545 = vmatprep.subr.bf16.mxu1 %v1544_v16 }
  0x28   :  { %180 = vxpose.xlu0.b32.cont [10/16] %v1073_v41, 128 }
  0x29   :  { %1368 = vmatmul.mubr.f32.gmra.mrb[2].mxu1 %v1029_v47  ;;  %v661_v47 = vld [vmem:[%s1995_s4 + $0x28] sm:$0xff] }
  0x2a   :  { %1370 = vmatprep.mubr.f32.mxu1 %v1032_v48  ;;  %1547 = vmatpush3.bf16.msra.mxu1 %v1544_v16  ;;  %v1536_v16 = vpack.c.bf16 %v687_v14, %v686_v13  ;;  %v590_v13 = vld [vmem:[%s1996_s3 + $0x70] sm:$0xff] }
  0x2b   :  { %1549 = vmatprep.subr.bf16.mxu1 %v1548_v19 }
  0x2c   :  { %181 = vxpose.xlu0.b32.cont [11/16] %v1076_v46, 128  ;;  %v660_v46 = vld [vmem:[%s1995_s4 + $0x20] sm:$0xff] }
  0x2d   :  { %1371 = vmatmul.mubr.f32.gmra.mrb[4].mxu1 %v1033_v52  ;;  %v1518_v51 = vpack.c.bf16 %v661_v47, %v660_v46 }
  0x2e   :  { %1373 = vmatprep.mubr.f32.mxu1 %v1036_v53  ;;  %1551 = vmatpush3.bf16.msra.mxu1 %v1548_v19  ;;  %v662_v53 = vld [vmem:[%s1995_s4 + $0x30] sm:$0xff] }
  0x2f   :  { %1553 = vmatprep.subr.bf16.mxu1 %v1552_v22  ;;  %v1522_v58 = vpack.c.bf16 %v663_v54, %v662_v53  ;;  %v578_v53 = vld [vmem:[%s1996_s3 + $0x10] sm:$0xff] }
  0x30   :  { %182 = vxpose.xlu0.b32.cont [12/16] %v1077_v50, 128  ;;  %v679_v50 = vld [vmem:[%s1995_s4 + $0xb8] sm:$0xff] }
  0x31   :  { %1374 = vmatmul.mubr.f32.gmra.mrb[6].mxu1 %v1037_v56  ;;  %v1520_v52 = vpack.c.bf16 %v679_v50, %v678_v49  ;;  %v680_v56 = vld [vmem:[%s1995_s4 + $0xc0] sm:$0xff] }
  0x32   :  { %1376 = vmatprep.mubr.f32.mxu1 %v1040_v57  ;;  %1555 = vmatpush3.bf16.msra.mxu1 %v1552_v22  ;;  %v681_v57 = vld [vmem:[%s1995_s4 + $0xc8] sm:$0xff]  ;;  %v576_v49 = vld [vmem:[%s1996_s3] sm:$0xff] }
  0x33   :  { %1557 = vmatprep.subr.bf16.mxu1 %v1556_v25 }
  0x34   :  { %183 = vxpose.xlu0.b32.cont [13/16] %v1080_v55, 128 }
  0x35   :  { %1377 = vmatmul.mubr.f32.gmra.mrb[8].mxu1 %v1041_v61  ;;  %v665_v61 = vld [vmem:[%s1995_s4 + $0x48] sm:$0xff] }
  0x36   :  { %1379 = vmatprep.mubr.f32.mxu1 %v1044_v62  ;;  %1559 = vmatpush3.bf16.msra.mxu1 %v1556_v25  ;;  %v1526_v1 = vpack.c.bf16 %v665_v61, %v664_v60  ;;  %v582_v61 = vld [vmem:[%s1996_s3 + $0x30] sm:$0xff] }
  0x37   :  { %1561 = vmatprep.subr.bf16.mxu1 %v1560_v28 }
  0x38   :  { %184 = vxpose.xlu0.b32.cont [14/16] %v1081_v59, 128  ;;  %v1524_v59 = vpack.c.bf16 %v681_v57, %v680_v56  ;;  %v580_v57 = vld [vmem:[%s1996_s3 + $0x20] sm:$0xff] }
  0x39   :  { %1380 = vmatmul.mubr.f32.gmra.mrb[10].mxu1 %v1045_v0  ;;  %v683_v0 = vld [vmem:[%s1995_s4 + $0xd8] sm:$0xff] }
  0x3a   :  { %1382 = vmatprep.mubr.f32.mxu1 %v1048_v2  ;;  %1563 = vmatpush3.bf16.msra.mxu1 %v1560_v28 }
  0x3b   :  { %1565 = vmatprep.subr.bf16.mxu1 %v1564_v31 }
  0x3c   :  { %185 = vxpose.xlu0.b32.cont [15/16] %v1084_v63, 128  ;;  %v682_v63 = vld [vmem:[%s1995_s4 + $0xd0] sm:$0xff] }
  0x3d   :  { %1383 = vmatmul.mubr.f32.gmra.mrb[12].mxu1 %v1049_v4  ;;  %v1528_v2 = vpack.c.bf16 %v683_v0, %v682_v63  ;;  %v667_v4 = vld [vmem:[%s1995_s4 + $0x58] sm:$0xff] }
  0x3e   :  { %1385 = vmatprep.mubr.f32.mxu1 %v1052_v6  ;;  %1567 = vmatpush3.bf16.msra.mxu1 %v1564_v31  ;;  %v684_v6 = vld [vmem:[%s1995_s4 + $0xe0] sm:$0xff]  ;;  %v1568_v31 = vpack.c.bf16 %v703_v30, %v702_v29  ;;  %v583_v63 = vld [vmem:[%s1996_s3 + $0x38] sm:$0xff] }
  0x40   :  { %186 = vxpose.xlu0.b32.end [16/16] %v1085_v3, 128  ;;  %v666_v3 = vld [vmem:[%s1995_s4 + $0x50] sm:$0xff]  ;;  %1569 = vmatprep.subr.bf16.mxu1 %v1568_v31 }
  0x41   :  { %1386 = vmatmul.mubr.f32.gmra.mrb[14].mxu1 %v1053_v7  ;;  %v685_v7 = vld [vmem:[%s1995_s4 + $0xe8] sm:$0xff]  ;;  %v1530_v8 = vpack.c.bf16 %v667_v4, %v666_v3 }
  0x42   :  { %v1532_v9 = vpack.c.bf16 %v685_v7, %v684_v6  ;;  %1571 = vmatpush3.bf16.msra.mxu1 %v1568_v31  ;;  %v585_v3 = vld [vmem:[%s1996_s3 + $0x48] sm:$0xff]  ;;  %v587_v7 = vld [vmem:[%s1996_s3 + $0x58] sm:$0xff] }
  0x84   :  { %v187_v34 = vpop.trf.xlu0 }
  0x85   :  { %1308 = vmatprep.mubr.f32.mxu0 %v187_v34 }
  0x88   :  { %v188_v41 = vpop.trf.xlu0 }
  0x89   :  { %1309 = vmatmul.mubr.f32.vlgmr.msra.gmra.mrb[0].mxu0 %v188_v41 }
  0x8a   :  { %1511 = vmatpush3.bf16.msra.mxu0 %v1510_v37 }
  0x8b   :  { %1513 = vmatprep.subr.bf16.mxu0 %v1512_v38 }
  0x8c   :  { %v189_v48 = vpop.trf.xlu0 }
  0x8d   :  { %1311 = vmatprep.mubr.f32.mxu0 %v189_v48 }
  0x8e   :  { %1515 = vmatpush3.bf16.msra.mxu0 %v1514_v44 }
  0x8f   :  { %1517 = vmatprep.subr.bf16.mxu0 %v1516_v45 }
  0x90   :  { %v190_v55 = vpop.trf.xlu0 }
  0x91   :  { %1312 = vmatmul.mubr.f32.gmra.mrb[2].mxu0 %v190_v55  ;;  %v579_v55 = vld [vmem:[%s1996_s3 + $0x18] sm:$0xff] }
  0x92   :  { %1519 = vmatpush3.bf16.msra.mxu0 %v1518_v51  ;;  %v577_v51 = vld [vmem:[%s1996_s3 + $0x8] sm:$0xff] }
  0x93   :  { %1521 = vmatprep.subr.bf16.mxu0 %v1520_v52 }
  0x94   :  { %v191_v62 = vpop.trf.xlu0 }
  0x95   :  { %1314 = vmatprep.mubr.f32.mxu0 %v191_v62 }
  0x96   :  { %1523 = vmatpush3.bf16.msra.mxu0 %v1522_v58 }
  0x97   :  { %1525 = vmatprep.subr.bf16.mxu0 %v1524_v59  ;;  %v581_v59 = vld [vmem:[%s1996_s3 + $0x28] sm:$0xff] }
  0x98   :  { %v192_v5 = vpop.trf.xlu0 }
  0x99   :  { %1315 = vmatmul.mubr.f32.gmra.mrb[4].mxu0 %v192_v5  ;;  %v586_v5 = vld [vmem:[%s1996_s3 + $0x50] sm:$0xff] }
  0x9a   :  { %1527 = vmatpush3.bf16.msra.mxu0 %v1526_v1  ;;  %v584_v1 = vld [vmem:[%s1996_s3 + $0x40] sm:$0xff] }
  0x9b   :  { %1529 = vmatprep.subr.bf16.mxu0 %v1528_v2 }
  0x9c   :  { %v193_v12 = vpop.trf.xlu0 }
  0x9d   :  { %1317 = vmatprep.mubr.f32.mxu0 %v193_v12 }
  0x9e   :  { %1531 = vmatpush3.bf16.msra.mxu0 %v1530_v8 }
  0x9f   :  { %1533 = vmatprep.subr.bf16.mxu0 %v1532_v9  ;;  %v588_v9 = vld [vmem:[%s1996_s3 + $0x60] sm:$0xff] }
  0xa0   :  { %v194_v19 = vpop.trf.xlu0 }
  0xa1   :  { %1318 = vmatmul.mubr.f32.gmra.mrb[6].mxu0 %v194_v19 }
  0xa2   :  { %1535 = vmatpush3.bf16.msra.mxu0 %v1534_v15  ;;  %v591_v15 = vld [vmem:[%s1996_s3 + $0x78] sm:$0xff] }
  0xa3   :  { %1537 = vmatprep.subr.bf16.mxu0 %v1536_v16 }
  0xa4   :  { %v195_v21 = vpop.trf.xlu0 }
  0xa5   :  { %1320 = vmatprep.mubr.f32.mxu0 %v195_v21 }
  0xa6   :  { %1539 = vmatpush3.bf16.msra.mxu0 %v1538_v20 }
  0xa8   :  { %v196_v22 = vpop.trf.xlu0 }
  0xa9   :  { %1321 = vmatmul.mubr.f32.gmra.mrb[8].mxu0 %v196_v22 }
  0xac   :  { %v197_v23 = vpop.trf.xlu0 }
  0xad   :  { %1323 = vmatprep.mubr.f32.mxu0 %v197_v23 }
  0xb0   :  { %v198_v24 = vpop.trf.xlu0 }
  0xb1   :  { %1324 = vmatmul.mubr.f32.gmra.mrb[10].mxu0 %v198_v24 }
  0xb4   :  { %v199_v25 = vpop.trf.xlu0 }
  0xb5   :  { %1326 = vmatprep.mubr.f32.mxu0 %v199_v25 }
  0xb8   :  { %v200_v26 = vpop.trf.xlu0 }
  0xb9   :  { %1327 = vmatmul.mubr.f32.gmra.mrb[12].mxu0 %v200_v26 }
  0xbc   :  { %v201_v27 = vpop.trf.xlu0 }
  0xbd   :  { %1329 = vmatprep.mubr.f32.mxu0 %v201_v27 }
  0xc0   :  { %v202_v28 = vpop.trf.xlu0 }
  0xc1   :  { %1330 = vmatmul.mubr.f32.gmra.mrb[14].mxu0 %v202_v28 }
  0xf8   :  { %v1366_v32 = vpop.f32.mrb[0].mxu1 }
  0xf9   :  { %v462_v33 = vpop.f32.mrb[1].mxu1 }
  0xfa   :  { %1420 = vmatprep.mubr.f32.mxu1 %v462_v33 }
  0xfb   :  { %1421 = vmatmul.mubr.f32.vlgmr.msra.gmra.mrb[16].mxu1 %v1366_v32 }
  0xfc   :  { %v1369_v34 = vpop.f32.mrb[2].mxu1 }
  0xfd   :  { %v472_v35 = vpop.f32.mrb[3].mxu1 }
  0xfe   :  { %1423 = vmatprep.mubr.f32.mxu1 %v472_v35 }
  0xff   :  { %1424 = vmatmul.mubr.f32.gmra.mrb[18].mxu1 %v1369_v34  ;;  %v1918_v34 = vld [vmem:[%s1997_s5] ss:$0 sm:$0xff] }
 0x100   :  { %v1372_v36 = vpop.f32.mrb[4].mxu1 }
 0x101   :  { %v482_v37 = vpop.f32.mrb[5].mxu1 }
 0x102   :  { %1426 = vmatprep.mubr.f32.mxu1 %v482_v37 }
 0x103   :  { %1427 = vmatmul.mubr.f32.gmra.mrb[20].mxu1 %v1372_v36 }
 0x104   :  { %v1375_v38 = vpop.f32.mrb[6].mxu1 }
 0x105   :  { %v492_v39 = vpop.f32.mrb[7].mxu1 }
 0x106   :  { %1429 = vmatprep.mubr.f32.mxu1 %v492_v39 }
 0x107   :  { %1430 = vmatmul.mubr.f32.gmra.mrb[22].mxu1 %v1375_v38 }
 0x108   :  { %v1378_v40 = vpop.f32.mrb[8].mxu1 }
 0x109   :  { %v502_v41 = vpop.f32.mrb[9].mxu1 }
 0x10a   :  { %1432 = vmatprep.mubr.f32.mxu1 %v502_v41 }
 0x10b   :  { %1433 = vmatmul.mubr.f32.gmra.mrb[24].mxu1 %v1378_v40 }
 0x10c   :  { %v1381_v42 = vpop.f32.mrb[10].mxu1 }
 0x10d   :  { %v512_v43 = vpop.f32.mrb[11].mxu1 }
 0x10e   :  { %1435 = vmatprep.mubr.f32.mxu1 %v512_v43 }
 0x10f   :  { %1436 = vmatmul.mubr.f32.gmra.mrb[26].mxu1 %v1381_v42 }
 0x110   :  { %v1384_v44 = vpop.f32.mrb[12].mxu1 }
 0x111   :  { %v522_v45 = vpop.f32.mrb[13].mxu1 }
 0x112   :  { %1438 = vmatprep.mubr.f32.mxu1 %v522_v45 }
 0x113   :  { %1439 = vmatmul.mubr.f32.gmra.mrb[28].mxu1 %v1384_v44 }
 0x114   :  { %v1387_v46 = vpop.f32.mrb[14].mxu1 }
 0x115   :  { %v532_v47 = vpop.f32.mrb[15].mxu1 }
 0x116   :  { %1441 = vmatprep.mubr.f32.mxu1 %v532_v47 }
 0x117   :  { %1442 = vmatmul.mubr.f32.gmra.mrb[30].mxu1 %v1387_v46 }
 0x15c   :  { %v1310_v48 = vpop.f32.mrb[0].mxu0 }
 0x15d   :  { %v269_v50 = vpop.f32.mrb[1].mxu0 }
 0x15e   :  { %775 = vmatprep.mubr.f32.mxu0 %v269_v50 }
 0x15f   :  { %776 = vmatmul.mubr.f32.vlgmr.msra.gmra.mrb[16].mxu0 %v576_v49 }
 0x160   :  { %780 = vmatprep.mubr.f32.mxu0 %v1310_v48 }
 0x163   :  { %781 = vmatmul.mubr.f32.gmra.mrb[18].mxu0 %v577_v51 }
 0x164   :  { %v1313_v52 = vpop.f32.mrb[2].mxu0 }
 0x165   :  { %v279_v54 = vpop.f32.mrb[3].mxu0 }
 0x166   :  { %785 = vmatprep.mubr.f32.mxu0 %v279_v54 }
 0x167   :  { %786 = vmatmul.mubr.f32.gmra.mrb[20].mxu0 %v578_v53 }
 0x168   :  { %790 = vmatprep.mubr.f32.mxu0 %v1313_v52 }
 0x16b   :  { %791 = vmatmul.mubr.f32.gmra.mrb[22].mxu0 %v579_v55 }
 0x16c   :  { %v1316_v56 = vpop.f32.mrb[4].mxu0 }
 0x16d   :  { %v289_v58 = vpop.f32.mrb[5].mxu0 }
 0x16e   :  { %795 = vmatprep.mubr.f32.mxu0 %v289_v58 }
 0x16f   :  { %796 = vmatmul.mubr.f32.gmra.mrb[24].mxu0 %v580_v57 }
 0x170   :  { %800 = vmatprep.mubr.f32.mxu0 %v1316_v56 }
 0x173   :  { %801 = vmatmul.mubr.f32.gmra.mrb[26].mxu0 %v581_v59 }
 0x174   :  { %v1319_v60 = vpop.f32.mrb[6].mxu0 }
 0x175   :  { %v299_v62 = vpop.f32.mrb[7].mxu0 }
 0x176   :  { %805 = vmatprep.mubr.f32.mxu0 %v299_v62 }
 0x177   :  { %806 = vmatmul.mubr.f32.gmra.mrb[28].mxu0 %v582_v61 }
 0x178   :  { %810 = vmatprep.mubr.f32.mxu0 %v1319_v60 }
 0x17b   :  { %811 = vmatmul.mubr.f32.gmra.mrb[30].mxu0 %v583_v63 }
 0x17c   :  { %v1322_v0 = vpop.f32.mrb[8].mxu0 }
 0x17d   :  { %v309_v2 = vpop.f32.mrb[9].mxu0 }
 0x17e   :  { %815 = vmatprep.mubr.f32.mxu0 %v309_v2 }
 0x17f   :  { %816 = vmatmul.mubr.f32.gmra.mrb[32].mxu0 %v584_v1 }
 0x180   :  { %820 = vmatprep.mubr.f32.mxu0 %v1322_v0 }
 0x183   :  { %821 = vmatmul.mubr.f32.gmra.mrb[34].mxu0 %v585_v3 }
 0x184   :  { %v1325_v4 = vpop.f32.mrb[10].mxu0 }
 0x185   :  { %v319_v6 = vpop.f32.mrb[11].mxu0 }
 0x186   :  { %825 = vmatprep.mubr.f32.mxu0 %v319_v6 }
 0x187   :  { %826 = vmatmul.mubr.f32.gmra.mrb[36].mxu0 %v586_v5 }
 0x188   :  { %830 = vmatprep.mubr.f32.mxu0 %v1325_v4 }
 0x18b   :  { %831 = vmatmul.mubr.f32.gmra.mrb[38].mxu0 %v587_v7 }
 0x18c   :  { %v1328_v8 = vpop.f32.mrb[12].mxu0 }
 0x18d   :  { %v329_v10 = vpop.f32.mrb[13].mxu0 }
 0x18e   :  { %835 = vmatprep.mubr.f32.mxu0 %v329_v10 }
 0x18f   :  { %836 = vmatmul.mubr.f32.gmra.mrb[40].mxu0 %v588_v9 }
 0x190   :  { %840 = vmatprep.mubr.f32.mxu0 %v1328_v8 }
 0x193   :  { %841 = vmatmul.mubr.f32.gmra.mrb[42].mxu0 %v589_v11 }
 0x194   :  { %v1331_v12 = vpop.f32.mrb[14].mxu0 }
 0x195   :  { %v339_v14 = vpop.f32.mrb[15].mxu0 }
 0x196   :  { %845 = vmatprep.mubr.f32.mxu0 %v339_v14 }
 0x197   :  { %846 = vmatmul.mubr.f32.gmra.mrb[44].mxu0 %v590_v13 }
 0x198   :  { %850 = vmatprep.mubr.f32.mxu0 %v1331_v12 }
 0x19b   :  { %851 = vmatmul.mubr.f32.gmra.mrb[46].mxu0 %v591_v15 }
 0x1ce   :  { %v1422_v16 = vpop.f32.mrb[16].mxu1 }
 0x1cf   :  { %v922_v17 = vpop.f32.mrb[17].mxu1 }
 0x1d2   :  { %v1425_v18 = vpop.f32.mrb[18].mxu1 }
 0x1d3   :  { %v932_v19 = vpop.f32.mrb[19].mxu1 }
 0x1d6   :  { %v1428_v20 = vpop.f32.mrb[20].mxu1 }
 0x1d7   :  { %v942_v21 = vpop.f32.mrb[21].mxu1 }
 0x1da   :  { %v1431_v22 = vpop.f32.mrb[22].mxu1 }
 0x1db   :  { %v952_v23 = vpop.f32.mrb[23].mxu1 }
 0x1de   :  { %v1899_v24 = vpop.f32.mrb[24].mxu1 }
 0x1df   :  { %v1901_v25 = vpop.f32.mrb[25].mxu1 }
 0x1e2   :  { %v1903_v26 = vpop.f32.mrb[26].mxu1 }
 0x1e3   :  { %v1905_v27 = vpop.f32.mrb[27].mxu1 }
 0x1e6   :  { %v1907_v28 = vpop.f32.mrb[28].mxu1 }
 0x1e7   :  { %v1909_v29 = vpop.f32.mrb[29].mxu1 }
 0x1ea   :  { %v1911_v30 = vpop.f32.mrb[30].mxu1 }
 0x1eb   :  { %v1913_v31 = vpop.f32.mrb[31].mxu1 }
 0x232   :  { %v1196_v32 = vpop.f32.mrb[16].mxu0 }
 0x233   :  { %v1197_v33 = vpop.f32.mrb[17].mxu0 }
 0x234   :  { %v1198_v35 = vadd.f32 %v1197_v33, %v1196_v32 }
 0x236   :  { %v1199_v36 = vpop.f32.mrb[18].mxu0  ;;  %v778_v37 = vadd.f32 %v1198_v35, %v1918_v34 }
 0x237   :  { %v1200_v38 = vpop.f32.mrb[19].mxu0 }
 0x238   :  { %v1201_v39 = vadd.f32 %v1200_v38, %v1199_v36  ;;  %v923_v40 = vadd.f32 %v922_v17, %v778_v37 }
 0x23a   :  { %v783_v41 = vadd.f32 %v1201_v39, %v1918_v34  ;;  %1001 = vst [vmem:[%s1998_s6] sm:$0xff] %v923_v40  ;;  %v1202_v42 = vpop.f32.mrb[20].mxu0 }
 0x23b   :  { %v1203_v43 = vpop.f32.mrb[21].mxu0 }
 0x23c   :  { %v928_v44 = vadd.f32 %v1422_v16, %v783_v41  ;;  %v1204_v45 = vadd.f32 %v1203_v43, %v1202_v42 }
 0x23e   :  { %1002 = vst [vmem:[%s1998_s6 + $0x8] sm:$0xff] %v928_v44  ;;  %v1205_v46 = vpop.f32.mrb[22].mxu0  ;;  %v788_v47 = vadd.f32 %v1204_v45, %v1918_v34 }
 0x23f   :  { %v1206_v48 = vpop.f32.mrb[23].mxu0 }
 0x240   :  { %v1207_v49 = vadd.f32 %v1206_v48, %v1205_v46  ;;  %v933_v50 = vadd.f32 %v932_v19, %v788_v47 }
 0x242   :  { %v793_v51 = vadd.f32 %v1207_v49, %v1918_v34  ;;  %1003 = vst [vmem:[%s1998_s6 + $0x10] sm:$0xff] %v933_v50  ;;  %v1208_v52 = vpop.f32.mrb[24].mxu0 }
 0x243   :  { %v1209_v53 = vpop.f32.mrb[25].mxu0 }
 0x244   :  { %v938_v54 = vadd.f32 %v1425_v18, %v793_v51  ;;  %v1210_v55 = vadd.f32 %v1209_v53, %v1208_v52 }
 0x246   :  { %1004 = vst [vmem:[%s1998_s6 + $0x18] sm:$0xff] %v938_v54  ;;  %v1211_v56 = vpop.f32.mrb[26].mxu0  ;;  %v798_v57 = vadd.f32 %v1210_v55, %v1918_v34 }
 0x247   :  { %v1212_v58 = vpop.f32.mrb[27].mxu0 }
 0x248   :  { %v1213_v59 = vadd.f32 %v1212_v58, %v1211_v56  ;;  %v943_v60 = vadd.f32 %v942_v21, %v798_v57 }
 0x24a   :  { %v803_v61 = vadd.f32 %v1213_v59, %v1918_v34  ;;  %1005 = vst [vmem:[%s1998_s6 + $0x20] sm:$0xff] %v943_v60  ;;  %v1214_v62 = vpop.f32.mrb[28].mxu0 }
 0x24b   :  { %v1215_v63 = vpop.f32.mrb[29].mxu0 }
 0x24c   :  { %v948_v0 = vadd.f32 %v1428_v20, %v803_v61  ;;  %v1216_v1 = vadd.f32 %v1215_v63, %v1214_v62 }
 0x24e   :  { %1006 = vst [vmem:[%s1998_s6 + $0x28] sm:$0xff] %v948_v0  ;;  %v1217_v2 = vpop.f32.mrb[30].mxu0  ;;  %v808_v3 = vadd.f32 %v1216_v1, %v1918_v34 }
 0x24f   :  { %v1218_v4 = vpop.f32.mrb[31].mxu0 }
 0x250   :  { %v1219_v5 = vadd.f32 %v1218_v4, %v1217_v2  ;;  %v953_v6 = vadd.f32 %v952_v23, %v808_v3 }
 0x252   :  { %v813_v7 = vadd.f32 %v1219_v5, %v1918_v34  ;;  %1007 = vst [vmem:[%s1998_s6 + $0x30] sm:$0xff] %v953_v6  ;;  %v1220_v8 = vpop.f32.mrb[32].mxu0 }
 0x253   :  { %v1221_v9 = vpop.f32.mrb[33].mxu0 }
 0x254   :  { %v958_v10 = vadd.f32 %v1431_v22, %v813_v7  ;;  %v1222_v11 = vadd.f32 %v1221_v9, %v1220_v8 }
 0x256   :  { %1008 = vst [vmem:[%s1998_s6 + $0x38] sm:$0xff] %v958_v10  ;;  %v1223_v12 = vpop.f32.mrb[34].mxu0  ;;  %v818_v13 = vadd.f32 %v1222_v11, %v1918_v34 }
 0x257   :  { %v1224_v14 = vpop.f32.mrb[35].mxu0 }
 0x258   :  { %v1225_v15 = vadd.f32 %v1224_v14, %v1223_v12  ;;  %v963_v16 = vadd.f32 %v1901_v25, %v818_v13 }
 0x25a   :  { %v823_v17 = vadd.f32 %v1225_v15, %v1918_v34  ;;  %1009 = vst [vmem:[%s1998_s6 + $0x40] sm:$0xff] %v963_v16  ;;  %v1226_v18 = vpop.f32.mrb[36].mxu0 }
 0x25b   :  { %v1227_v19 = vpop.f32.mrb[37].mxu0 }
 0x25c   :  { %v968_v20 = vadd.f32 %v1899_v24, %v823_v17  ;;  %v1228_v21 = vadd.f32 %v1227_v19, %v1226_v18 }
 0x25e   :  { %1010 = vst [vmem:[%s1998_s6 + $0x48] sm:$0xff] %v968_v20  ;;  %v1229_v22 = vpop.f32.mrb[38].mxu0  ;;  %v828_v23 = vadd.f32 %v1228_v21, %v1918_v34 }
 0x25f   :  { %v1230_v32 = vpop.f32.mrb[39].mxu0 }
 0x260   :  { %v1231_v25 = vadd.f32 %v1230_v32, %v1229_v22  ;;  %v973_v33 = vadd.f32 %v1905_v27, %v828_v23 }
 0x262   :  { %v833_v35 = vadd.f32 %v1231_v25, %v1918_v34  ;;  %1011 = vst [vmem:[%s1998_s6 + $0x50] sm:$0xff] %v973_v33  ;;  %v1232_v36 = vpop.f32.mrb[40].mxu0 }
 0x263   :  { %v1233_v24 = vpop.f32.mrb[41].mxu0 }
 0x264   :  { %v978_v37 = vadd.f32 %v1903_v26, %v833_v35  ;;  %v1234_v38 = vadd.f32 %v1233_v24, %v1232_v36 }
 0x266   :  { %1012 = vst [vmem:[%s1998_s6 + $0x58] sm:$0xff] %v978_v37  ;;  %v1235_v39 = vpop.f32.mrb[42].mxu0  ;;  %v838_v40 = vadd.f32 %v1234_v38, %v1918_v34 }
 0x267   :  { %v1236_v41 = vpop.f32.mrb[43].mxu0 }
 0x268   :  { %v1237_v27 = vadd.f32 %v1236_v41, %v1235_v39  ;;  %v983_v42 = vadd.f32 %v1909_v29, %v838_v40 }
 0x26a   :  { %v843_v43 = vadd.f32 %v1237_v27, %v1918_v34  ;;  %1013 = vst [vmem:[%s1998_s6 + $0x60] sm:$0xff] %v983_v42  ;;  %v1238_v44 = vpop.f32.mrb[44].mxu0 }
 0x26b   :  { %v1239_v26 = vpop.f32.mrb[45].mxu0 }
 0x26c   :  { %v988_v45 = vadd.f32 %v1907_v28, %v843_v43  ;;  %v1240_v46 = vadd.f32 %v1239_v26, %v1238_v44 }
 0x26e   :  { %1014 = vst [vmem:[%s1998_s6 + $0x68] sm:$0xff] %v988_v45  ;;  %v1241_v47 = vpop.f32.mrb[46].mxu0  ;;  %v848_v48 = vadd.f32 %v1240_v46, %v1918_v34 }
 0x26f   :  { %v1242_v49 = vpop.f32.mrb[47].mxu0 }
 0x270   :  { %v1243_v29 = vadd.f32 %v1242_v49, %v1241_v47  ;;  %v993_v50 = vadd.f32 %v1913_v31, %v848_v48 }
 0x272   :  { %v853_v51 = vadd.f32 %v1243_v29, %v1918_v34  ;;  %1015 = vst [vmem:[%s1998_s6 + $0x70] sm:$0xff] %v993_v50 }
 0x274   :  { %v998_v28 = vadd.f32 %v1911_v30, %v853_v51 }
 0x276   :  { %1016 = vst [vmem:[%s1998_s6 + $0x78] sm:$0xff] %v998_v28 }

</bundles_post_ra>
